<compile_context>
chip_gen: v7x
topology: tpu7x:2x2x1
jax: 0.10.0
libtpu: 0.0.40
codegen_flags: <defaults>
</compile_context>

<pallas_src>
import functools

import jax
import jax.numpy as jnp
from jax import lax
from jax.experimental import pallas as pl
from jax.experimental.pallas import tpu as pltpu


_COMPUTE_DTYPE = jnp.bfloat16           # MXU input dtype (f32 accumulation)
_VMEM_LIMIT = 48 * 1024 * 1024          # safe on v7x (64 MiB) and v5e/v6e (128 MiB)


# ----------------------------------------------------------------------------
# tile-size helper: largest aligned tile <= desired that divides the dim,
# falling back to the full dimension (always a legal block shape).
# align=16 for bf16 sublane dims, 128 for lane dims.
# ----------------------------------------------------------------------------
def _pick_tile(dim, desired, align):
    if dim <= desired:
        return dim
    t = (desired // align) * align
    while t >= align:
        if dim % t == 0:
            return t
        t -= align
    return dim


# ----------------------------------------------------------------------------
# Kernel 1: fused QKV projection — q = x@Wq, k = x@Wk, v = x@Wv in one pass
# ----------------------------------------------------------------------------
def _qkv_proj_kernel(x_ref, wq_ref, wk_ref, wv_ref,
                     q_ref, k_ref, v_ref,
                     qacc, kacc, vacc):
    kidx = pl.program_id(2)

    @pl.when(kidx == 0)
    def _():
        qacc[...] = jnp.zeros_like(qacc)
        kacc[...] = jnp.zeros_like(kacc)
        vacc[...] = jnp.zeros_like(vacc)

    x = x_ref[...]  # loaded once, reused for all three bf16 MXU matmuls
    qacc[...] += jnp.dot(x, wq_ref[...], preferred_element_type=jnp.float32)
    kacc[...] += jnp.dot(x, wk_ref[...], preferred_element_type=jnp.float32)
    vacc[...] += jnp.dot(x, wv_ref[...], preferred_element_type=jnp.float32)

    @pl.when(kidx == pl.num_programs(2) - 1)
    def _():
        q_ref[...] = qacc[...].astype(q_ref.dtype)
        k_ref[...] = kacc[...].astype(k_ref.dtype)
        v_ref[...] = vacc[...].astype(v_ref.dtype)


def qkv_projection(x2d, wq, wk, wv, *, tm=512, tn=256, tk=512):
    """x2d: (M, K) bf16; wq/wk/wv: (K, HD) bf16 -> three (M, HD) bf16 arrays."""
    M, K = x2d.shape
    HD = wq.shape[1]
    tm = _pick_tile(M, tm, 16)      # sublane dim (bf16 packs 16 rows / vreg)
    tn = _pick_tile(HD, tn, 128)    # lane dim
    tk = _pick_tile(K, tk, 128)
    grid = (M // tm, HD // tn, K // tk)

    w_spec = lambda: pl.BlockSpec((tk, tn), lambda i, j, k: (k, j))
    o_spec = lambda: pl.BlockSpec((tm, tn), lambda i, j, k: (i, j))

    return pl.pallas_call(
        _qkv_proj_kernel,
        out_shape=tuple(jax.ShapeDtypeStruct((M, HD), x2d.dtype) for _ in range(3)),
        grid_spec=pltpu.PrefetchScalarGridSpec(
            num_scalar_prefetch=0,
            grid=grid,
            in_specs=[
                pl.BlockSpec((tm, tk), lambda i, j, k: (i, k)),
                w_spec(), w_spec(), w_spec(),
            ],
            out_specs=[o_spec(), o_spec(), o_spec()],
            scratch_shapes=[pltpu.VMEM((tm, tn), jnp.float32) for _ in range(3)],
        ),
        compiler_params=pltpu.CompilerParams(
            dimension_semantics=("parallel", "parallel", "arbitrary"),
            vmem_limit_bytes=_VMEM_LIMIT,
        ),
    )(x2d, wq, wk, wv)


# ----------------------------------------------------------------------------
# Kernel 2: flash-style attention on (B, N, H*D) buffers (online softmax)
# ----------------------------------------------------------------------------
def _flash_attn_kernel(q_ref, k_ref, v_ref, o_ref, m_ref, l_ref, acc_ref,
                       *, num_heads, head_dim):
    ki = pl.program_id(2)
    tq = q_ref.shape[1]

    @pl.when(ki == 0)
    def _():
        m_ref[...] = jnp.full_like(m_ref, -jnp.inf)
        l_ref[...] = jnp.zeros_like(l_ref)
        acc_ref[...] = jnp.zeros_like(acc_ref)

    alphas = []
    pvs = []
    for h in range(num_heads):
        sl = pl.ds(h * head_dim, head_dim)          # static start: free slice
        qh = q_ref[0, :, sl]                        # (tq, D)  bf16 (scale folded in Wq)
        kh = k_ref[0, :, sl]                        # (tkv, D) bf16
        vh = v_ref[0, :, sl]                        # (tkv, D) bf16

        # s = q @ k^T via a transposed-RHS contraction (no k.T relayout);
        # bf16 in, f32 accumulate on the MXU.
        s = lax.dot_general(
            qh, kh,
            dimension_numbers=(((1,), (1,)), ((), ())),
            preferred_element_type=jnp.float32)     # (tq, tkv) f32

        m_prev = m_ref[h]                           # (tq, 1) f32
        m_new = jnp.maximum(m_prev, jnp.max(s, axis=-1, keepdims=True))
        alpha = jnp.exp(m_prev - m_new)             # (tq, 1)
        p = jnp.exp(s - m_new)                      # (tq, tkv) f32

        l_ref[h] = alpha * l_ref[h] + jnp.sum(p, axis=-1, keepdims=True)
        m_ref[h] = m_new

        pv = jnp.dot(p.astype(vh.dtype), vh,
                     preferred_element_type=jnp.float32)   # (tq, D) f32
        pvs.append(pv)
        alphas.append(jnp.broadcast_to(alpha, (tq, head_dim)))

    # Single full-width, lane-dense accumulator update per kv step (no per-head
    # masked sub-128-lane read-modify-write stores).
    alpha_full = jnp.concatenate(alphas, axis=-1) if num_heads > 1 else alphas[0]
    pv_full = jnp.concatenate(pvs, axis=-1) if num_heads > 1 else pvs[0]
    acc_ref[...] = alpha_full * acc_ref[...] + pv_full

    @pl.when(ki == pl.num_programs(2) - 1)
    def _():
        invs = [jnp.broadcast_to(pl.reciprocal(l_ref[h], approx=False),
                                 (tq, head_dim))
                for h in range(num_heads)]
        inv_full = jnp.concatenate(invs, axis=-1) if num_heads > 1 else invs[0]
        # one full-width lane-dense store of the whole output tile
        o_ref[0] = (acc_ref[...] * inv_full).astype(o_ref.dtype)


def flash_attention(q, k, v, *, num_heads, head_dim, out_dtype=None,
                    tq=256, tkv=256):
    """q, k, v: (B, N, H*D) bf16, heads in D-wide column groups -> (B, N, H*D)."""
    B, N, HD = q.shape
    if out_dtype is None:
        out_dtype = q.dtype
    tq = _pick_tile(N, tq, 16)
    tkv = _pick_tile(N, tkv, 16)
    grid = (B, N // tq, N // tkv)

    kernel = functools.partial(_flash_attn_kernel, num_heads=num_heads,
                               head_dim=head_dim)
    q_spec = pl.BlockSpec((1, tq, HD), lambda b, qi, ki: (b, qi, 0))
    kv_spec = pl.BlockSpec((1, tkv, HD), lambda b, qi, ki: (b, ki, 0))
    o_spec = pl.BlockSpec((1, tq, HD), lambda b, qi, ki: (b, qi, 0))

    return pl.pallas_call(
        kernel,
        out_shape=jax.ShapeDtypeStruct((B, N, HD), out_dtype),
        grid_spec=pltpu.PrefetchScalarGridSpec(
            num_scalar_prefetch=0,
            grid=grid,
            in_specs=[q_spec, kv_spec, kv_spec],
            out_specs=o_spec,
            scratch_shapes=[
                pltpu.VMEM((num_heads, tq, 1), jnp.float32),   # running max m
                pltpu.VMEM((num_heads, tq, 1), jnp.float32),   # running sum l
                pltpu.VMEM((tq, HD), jnp.float32),             # full-width acc
            ],
        ),
        compiler_params=pltpu.CompilerParams(
            dimension_semantics=("parallel", "parallel", "arbitrary"),
            vmem_limit_bytes=_VMEM_LIMIT,
        ),
    )(q, k, v)


# ----------------------------------------------------------------------------
# Kernel 3: output projection (tiled matmul + bias)
# ----------------------------------------------------------------------------
def _out_proj_kernel(x_ref, w_ref, b_ref, o_ref, acc_ref):
    kidx = pl.program_id(2)

    @pl.when(kidx == 0)
    def _():
        acc_ref[...] = jnp.zeros_like(acc_ref)

    acc_ref[...] += jnp.dot(x_ref[...], w_ref[...],
                            preferred_element_type=jnp.float32)

    @pl.when(kidx == pl.num_programs(2) - 1)
    def _():
        o_ref[...] = (acc_ref[...] + b_ref[...].astype(jnp.float32)
                      ).astype(o_ref.dtype)


def output_projection(x2d, w, b, *, out_dtype=None, tm=512, tn=256, tk=512):
    """x2d: (M, K) bf16; w: (K, N) bf16; b: (N,) f32 -> (M, N) out_dtype."""
    M, K = x2d.shape
    N = w.shape[1]
    if out_dtype is None:
        out_dtype = x2d.dtype
    tm = _pick_tile(M, tm, 16)
    tn = _pick_tile(N, tn, 128)
    tk = _pick_tile(K, tk, 128)
    grid = (M // tm, N // tn, K // tk)

    return pl.pallas_call(
        _out_proj_kernel,
        out_shape=jax.ShapeDtypeStruct((M, N), out_dtype),
        grid_spec=pltpu.PrefetchScalarGridSpec(
            num_scalar_prefetch=0,
            grid=grid,
            in_specs=[
                pl.BlockSpec((tm, tk), lambda i, j, k: (i, k)),
                pl.BlockSpec((tk, tn), lambda i, j, k: (k, j)),
                pl.BlockSpec((1, tn), lambda i, j, k: (0, j)),
            ],
            out_specs=pl.BlockSpec((tm, tn), lambda i, j, k: (i, j)),
            scratch_shapes=[pltpu.VMEM((tm, tn), jnp.float32)],
        ),
        compiler_params=pltpu.CompilerParams(
            dimension_semantics=("parallel", "parallel", "arbitrary"),
            vmem_limit_bytes=_VMEM_LIMIT,
        ),
    )(x2d, w, b.reshape(1, -1))


# ----------------------------------------------------------------------------
# Module-equivalent wrapper
# ----------------------------------------------------------------------------
class MultiHeadAttentionPallas:
    def __init__(self, embed_dim, num_heads=8, head_dim=64, p_drop=0.0, key=None):
        inner_dim = head_dim * num_heads
        self.embed_dim = embed_dim
        self.num_heads = num_heads
        self.head_dim = head_dim
        self.inner_dim = inner_dim
        self.scaling_factor = head_dim ** (-0.5)
        self.needs_projection = not (num_heads == 1 and head_dim == embed_dim)
        # TODO(synk): p_drop (dropout) ignored — eval/inference semantics only.

        if key is None:
            key = jax.random.PRNGKey(0)
        k1, k2, k3 = jax.random.split(key, 3)

        # PyTorch-style Linear weights; pre-split, pre-transposed, pre-scaled
        # and pre-cast ONCE at init (no per-forward .T / scale / cast).
        bound_qkv = 1.0 / (embed_dim ** 0.5)
        w_qkv = jax.random.uniform(
            k1, (inner_dim * 3, embed_dim), jnp.float32, -bound_qkv, bound_qkv)
        wq, wk, wv = jnp.split(w_qkv, 3, axis=0)          # each (inner, E)

        # f32 master copies kept only for the correctness reference.
        self.wq_f32 = jnp.asarray(wq.T)                   # (E, inner)
        self.wk_f32 = jnp.asarray(wk.T)
        self.wv_f32 = jnp.asarray(wv.T)

        # Kernel-path weights: softmax scale folded into Wq, MXU runs in bf16.
        self.wq_t = (self.wq_f32 * self.scaling_factor).astype(_COMPUTE_DTYPE)
        self.wk_t = self.wk_f32.astype(_COMPUTE_DTYPE)
        self.wv_t = self.wv_f32.astype(_COMPUTE_DTYPE)

        if self.needs_projection:
            bound_o = 1.0 / (inner_dim ** 0.5)
            w_out = jax.random.uniform(
                k2, (embed_dim, inner_dim), jnp.float32, -bound_o, bound_o)
            self.wout_f32 = jnp.asarray(w_out.T)          # (inner, E)
            self.wout_t = self.wout_f32.astype(_COMPUTE_DTYPE)
            self.b_out = jax.random.uniform(
                k3, (embed_dim,), jnp.float32, -bound_o, bound_o)
        else:
            self.wout_f32 = None
            self.wout_t = None
            self.b_out = None

    def __call__(self, x):
        # x: (B, N, E)
        B, N, E = x.shape
        H, D = self.num_heads, self.head_dim
        HD = H * D
        out_dtype = x.dtype

        # --- fused QKV projection (one pass over x, three tiled matmuls) ---
        x2d = x.reshape(B * N, E).astype(_COMPUTE_DTYPE)   # bf16 into the MXU
        q, k, v = qkv_projection(x2d, self.wq_t, self.wk_t, self.wv_t)
        q = q.reshape(B, N, HD)
        k = k.reshape(B, N, HD)
        v = v.reshape(B, N, HD)

        # --- flash attention core, heads handled in-kernel (no transposes) ---
        attn_dtype = _COMPUTE_DTYPE if self.needs_projection else out_dtype
        out = flash_attention(q, k, v, num_heads=H, head_dim=D,
                              out_dtype=attn_dtype)         # (B, N, HD)

        # --- output projection ---
        out2d = out.reshape(B * N, HD)                       # free reshape
        if self.needs_projection:
            out2d = output_projection(out2d, self.wout_t, self.b_out,
                                      out_dtype=out_dtype)
            return out2d.reshape(B, N, E)
        return out2d.reshape(B, N, HD)


# ----------------------------------------------------------------------------
# Plain-JAX (f32, exact PyTorch math) reference for the correctness check
# ----------------------------------------------------------------------------
def reference_forward(mod, x):
    B, N, E = x.shape
    H, D = mod.num_heads, mod.head_dim
    q = x @ mod.wq_f32
    k = x @ mod.wk_f32
    v = x @ mod.wv_f32

    def split_heads(t):  # 'b n (h d) -> b h n d'
        return t.reshape(B, N, H, D).transpose(0, 2, 1, 3)

    q, k, v = map(split_heads, (q, k, v))
    s = jnp.einsum('bhid,bhjd->bhij', q, k) * mod.scaling_factor
    a = jax.nn.softmax(s, axis=-1)
    o = jnp.einsum('bhij,bhjd->bhid', a, v)
    o = o.transpose(0, 2, 1, 3).reshape(B, N, H * D)
    if mod.needs_projection:
        o = o @ mod.wout_f32 + mod.b_out
    return o


if __name__ == "__main__":
    # Small deterministic example consistent with the module's forward:
    # batch=2, seq=8, embed_dim=32, num_heads=4, head_dim=16.
    key = jax.random.PRNGKey(0)
    kx, kp = jax.random.split(key)

    B, N, E = 2, 8, 32
    x = jax.random.normal(kx, (B, N, E), dtype=jnp.float32)

    mha = MultiHeadAttentionPallas(embed_dim=E, num_heads=4, head_dim=16,
                                   p_drop=0.0, key=kp)

    out = mha(x)
    out = jax.block_until_ready(out)

    ref = reference_forward(mha, x)
    assert out.shape == (B, N, E), out.shape
    # Tolerance covers bf16 MXU inputs (f32 accumulation) vs. the f32 reference.
    assert jnp.allclose(out, ref, atol=3e-2, rtol=3e-2), "mismatch vs reference"

    print("KERNEL_OK")
</pallas_src>

<mosaic_0001>
module attributes {stable_mosaic.version = 11 : i64} {
  func.func @_qkv_proj_kernel(%arg0: i32, %arg1: i32, %arg2: i32, %arg3: memref<16x32xbf16, #tpu.memory_space<vmem>>, %arg4: memref<32x64xbf16, #tpu.memory_space<vmem>>, %arg5: memref<32x64xbf16, #tpu.memory_space<vmem>>, %arg6: memref<32x64xbf16, #tpu.memory_space<vmem>>, %arg7: memref<16x64xbf16, #tpu.memory_space<vmem>>, %arg8: memref<16x64xbf16, #tpu.memory_space<vmem>>, %arg9: memref<16x64xbf16, #tpu.memory_space<vmem>>, %arg10: memref<16x64xf32, #tpu.memory_space<vmem>>, %arg11: memref<16x64xf32, #tpu.memory_space<vmem>>, %arg12: memref<16x64xf32, #tpu.memory_space<vmem>>) attributes {dimension_semantics = [#tpu.dimension_semantics<parallel>, #tpu.dimension_semantics<parallel>, #tpu.dimension_semantics<arbitrary>], iteration_bounds = array<i64: 1, 1, 1>, scalar_prefetch = 0 : i64, scratch_operands = 3 : i64, tpu.core_type = #tpu.core_type<tc>, window_params = [{transform_indices = @transform_0, window_bounds = array<i64: 16, 32>}, {transform_indices = @transform_1, window_bounds = array<i64: 32, 64>}, {transform_indices = @transform_2, window_bounds = array<i64: 32, 64>}, {transform_indices = @transform_3, window_bounds = array<i64: 32, 64>}, {transform_indices = @transform_4, window_bounds = array<i64: 16, 64>}, {transform_indices = @transform_5, window_bounds = array<i64: 16, 64>}, {transform_indices = @transform_6, window_bounds = array<i64: 16, 64>}]} {
    %c0_i32 = arith.constant 0 : i32
    %0 = arith.cmpi eq, %arg2, %c0_i32 : i32
    %1 = arith.extui %0 : i1 to i32
    %c0_i32_0 = arith.constant 0 : i32
    %2 = arith.cmpi ne, %1, %c0_i32_0 : i32
    scf.if %2 {
      %cst_24 = arith.constant 0.000000e+00 : f32
      %22 = vector.broadcast %cst_24 : f32 to vector<16x64xf32>
      %c0_25 = arith.constant 0 : index
      %c0_26 = arith.constant 0 : index
      %23 = vector.load %arg10[%c0_25, %c0_26] : memref<16x64xf32, #tpu.memory_space<vmem>>, vector<16x64xf32>
      tpu.vector_store %arg10[%c0_25, %c0_26], %22 {strides = array<i32>} : memref<16x64xf32, #tpu.memory_space<vmem>>, vector<16x64xf32>,
      %cst_27 = arith.constant 0.000000e+00 : f32
      %24 = vector.broadcast %cst_27 : f32 to vector<16x64xf32>
      %c0_28 = arith.constant 0 : index
      %c0_29 = arith.constant 0 : index
      %25 = vector.load %arg11[%c0_28, %c0_29] : memref<16x64xf32, #tpu.memory_space<vmem>>, vector<16x64xf32>
      tpu.vector_store %arg11[%c0_28, %c0_29], %24 {strides = array<i32>} : memref<16x64xf32, #tpu.memory_space<vmem>>, vector<16x64xf32>,
      %cst_30 = arith.constant 0.000000e+00 : f32
      %26 = vector.broadcast %cst_30 : f32 to vector<16x64xf32>
      %c0_31 = arith.constant 0 : index
      %c0_32 = arith.constant 0 : index
      %27 = vector.load %arg12[%c0_31, %c0_32] : memref<16x64xf32, #tpu.memory_space<vmem>>, vector<16x64xf32>
      tpu.vector_store %arg12[%c0_31, %c0_32], %26 {strides = array<i32>} : memref<16x64xf32, #tpu.memory_space<vmem>>, vector<16x64xf32>,
    } else {
    }
    %c0 = arith.constant 0 : index
    %c0_1 = arith.constant 0 : index
    %3 = vector.load %arg3[%c0, %c0_1] : memref<16x32xbf16, #tpu.memory_space<vmem>>, vector<16x32xbf16>
    %c0_2 = arith.constant 0 : index
    %c0_3 = arith.constant 0 : index
    %4 = vector.load %arg10[%c0_2, %c0_3] : memref<16x64xf32, #tpu.memory_space<vmem>>, vector<16x64xf32>
    %c0_4 = arith.constant 0 : index
    %c0_5 = arith.constant 0 : index
    %5 = vector.load %arg4[%c0_4, %c0_5] : memref<32x64xbf16, #tpu.memory_space<vmem>>, vector<32x64xbf16>
    %cst = arith.constant dense<0.000000e+00> : vector<16x64xf32>
    %6 = tpu.matmul %3, %5, %cst {dimension_numbers = #tpu.dot_dimension_numbers<[1], [0], [0], [1], [0, 0, 1, 1], [], []>} : vector<16x32xbf16>, vector<32x64xbf16>, vector<16x64xf32> -> vector<16x64xf32>
    %7 = arith.addf %4, %6 : vector<16x64xf32>
    %c0_6 = arith.constant 0 : index
    %c0_7 = arith.constant 0 : index
    %8 = vector.load %arg10[%c0_6, %c0_7] : memref<16x64xf32, #tpu.memory_space<vmem>>, vector<16x64xf32>
    tpu.vector_store %arg10[%c0_6, %c0_7], %7 {strides = array<i32>} : memref<16x64xf32, #tpu.memory_space<vmem>>, vector<16x64xf32>,
    %c0_8 = arith.constant 0 : index
    %c0_9 = arith.constant 0 : index
    %9 = vector.load %arg11[%c0_8, %c0_9] : memref<16x64xf32, #tpu.memory_space<vmem>>, vector<16x64xf32>
    %c0_10 = arith.constant 0 : index
    %c0_11 = arith.constant 0 : index
    %10 = vector.load %arg5[%c0_10, %c0_11] : memref<32x64xbf16, #tpu.memory_space<vmem>>, vector<32x64xbf16>
    %cst_12 = arith.constant dense<0.000000e+00> : vector<16x64xf32>
    %11 = tpu.matmul %3, %10, %cst_12 {dimension_numbers = #tpu.dot_dimension_numbers<[1], [0], [0], [1], [0, 0, 1, 1], [], []>} : vector<16x32xbf16>, vector<32x64xbf16>, vector<16x64xf32> -> vector<16x64xf32>
    %12 = arith.addf %9, %11 : vector<16x64xf32>
    %c0_13 = arith.constant 0 : index
    %c0_14 = arith.constant 0 : index
    %13 = vector.load %arg11[%c0_13, %c0_14] : memref<16x64xf32, #tpu.memory_space<vmem>>, vector<16x64xf32>
    tpu.vector_store %arg11[%c0_13, %c0_14], %12 {strides = array<i32>} : memref<16x64xf32, #tpu.memory_space<vmem>>, vector<16x64xf32>,
    %c0_15 = arith.constant 0 : index
    %c0_16 = arith.constant 0 : index
    %14 = vector.load %arg12[%c0_15, %c0_16] : memref<16x64xf32, #tpu.memory_space<vmem>>, vector<16x64xf32>
    %c0_17 = arith.constant 0 : index
    %c0_18 = arith.constant 0 : index
    %15 = vector.load %arg6[%c0_17, %c0_18] : memref<32x64xbf16, #tpu.memory_space<vmem>>, vector<32x64xbf16>
    %cst_19 = arith.constant dense<0.000000e+00> : vector<16x64xf32>
    %16 = tpu.matmul %3, %15, %cst_19 {dimension_numbers = #tpu.dot_dimension_numbers<[1], [0], [0], [1], [0, 0, 1, 1], [], []>} : vector<16x32xbf16>, vector<32x64xbf16>, vector<16x64xf32> -> vector<16x64xf32>
    %17 = arith.addf %14, %16 : vector<16x64xf32>
    %c0_20 = arith.constant 0 : index
    %c0_21 = arith.constant 0 : index
    %18 = vector.load %arg12[%c0_20, %c0_21] : memref<16x64xf32, #tpu.memory_space<vmem>>, vector<16x64xf32>
    tpu.vector_store %arg12[%c0_20, %c0_21], %17 {strides = array<i32>} : memref<16x64xf32, #tpu.memory_space<vmem>>, vector<16x64xf32>,
    %c0_i32_22 = arith.constant 0 : i32
    %19 = arith.cmpi eq, %arg2, %c0_i32_22 : i32
    %20 = arith.extui %19 : i1 to i32
    %c0_i32_23 = arith.constant 0 : i32
    %21 = arith.cmpi ne, %20, %c0_i32_23 : i32
    scf.if %21 {
      %c0_24 = arith.constant 0 : index
      %c0_25 = arith.constant 0 : index
      %22 = vector.load %arg10[%c0_24, %c0_25] : memref<16x64xf32, #tpu.memory_space<vmem>>, vector<16x64xf32>
      %23 = arith.truncf %22 : vector<16x64xf32> to vector<16x64xbf16>
      %c0_26 = arith.constant 0 : index
      %c0_27 = arith.constant 0 : index
      %24 = vector.load %arg7[%c0_26, %c0_27] : memref<16x64xbf16, #tpu.memory_space<vmem>>, vector<16x64xbf16>
      tpu.vector_store %arg7[%c0_26, %c0_27], %23 {strides = array<i32>} : memref<16x64xbf16, #tpu.memory_space<vmem>>, vector<16x64xbf16>,
      %c0_28 = arith.constant 0 : index
      %c0_29 = arith.constant 0 : index
      %25 = vector.load %arg11[%c0_28, %c0_29] : memref<16x64xf32, #tpu.memory_space<vmem>>, vector<16x64xf32>
      %26 = arith.truncf %25 : vector<16x64xf32> to vector<16x64xbf16>
      %c0_30 = arith.constant 0 : index
      %c0_31 = arith.constant 0 : index
      %27 = vector.load %arg8[%c0_30, %c0_31] : memref<16x64xbf16, #tpu.memory_space<vmem>>, vector<16x64xbf16>
      tpu.vector_store %arg8[%c0_30, %c0_31], %26 {strides = array<i32>} : memref<16x64xbf16, #tpu.memory_space<vmem>>, vector<16x64xbf16>,
      %c0_32 = arith.constant 0 : index
      %c0_33 = arith.constant 0 : index
      %28 = vector.load %arg12[%c0_32, %c0_33] : memref<16x64xf32, #tpu.memory_space<vmem>>, vector<16x64xf32>
      %29 = arith.truncf %28 : vector<16x64xf32> to vector<16x64xbf16>
      %c0_34 = arith.constant 0 : index
      %c0_35 = arith.constant 0 : index
      %30 = vector.load %arg9[%c0_34, %c0_35] : memref<16x64xbf16, #tpu.memory_space<vmem>>, vector<16x64xbf16>
      tpu.vector_store %arg9[%c0_34, %c0_35], %29 {strides = array<i32>} : memref<16x64xbf16, #tpu.memory_space<vmem>>, vector<16x64xbf16>,
    } else {
    }
    return
  }
  func.func @transform_0(%arg0: i32, %arg1: i32, %arg2: i32) -> (i32, i32) {
    %c0_i32 = arith.constant 0 : i32
    return %arg0, %arg2 : i32, i32
  }
  func.func @transform_1(%arg0: i32, %arg1: i32, %arg2: i32) -> (i32, i32) {
    %c0_i32 = arith.constant 0 : i32
    return %arg2, %arg1 : i32, i32
  }
  func.func @transform_2(%arg0: i32, %arg1: i32, %arg2: i32) -> (i32, i32) {
    %c0_i32 = arith.constant 0 : i32
    return %arg2, %arg1 : i32, i32
  }
  func.func @transform_3(%arg0: i32, %arg1: i32, %arg2: i32) -> (i32, i32) {
    %c0_i32 = arith.constant 0 : i32
    return %arg2, %arg1 : i32, i32
  }
  func.func @transform_4(%arg0: i32, %arg1: i32, %arg2: i32) -> (i32, i32) {
    %c0_i32 = arith.constant 0 : i32
    return %arg0, %arg1 : i32, i32
  }
  func.func @transform_5(%arg0: i32, %arg1: i32, %arg2: i32) -> (i32, i32) {
    %c0_i32 = arith.constant 0 : i32
    return %arg0, %arg1 : i32, i32
  }
  func.func @transform_6(%arg0: i32, %arg1: i32, %arg2: i32) -> (i32, i32) {
    %c0_i32 = arith.constant 0 : i32
    return %arg0, %arg1 : i32, i32
  }
}

</mosaic_0001>

<bundles_post_ra>
// kernel: tpu_custom_call.1
= control target key start
LH: loop header
LB: loop body
LE: loop exit
PB: predicated region body
PF: predicated region fallthrough
CT: control target
= control target key end

     0   :  { %12 = vsyncpa [#allocation6], 0  ;;  %s810_s0 = inlined_call_operand.hbm [shape: bf16[16,32], index: 0, kind: input, shape index: {}]   ;;  %s811_s1 = inlined_call_operand.hbm [shape: bf16[32,64], index: 1, kind: input, shape index: {}]   ;;  %s812_s2 = inlined_call_operand.hbm [shape: bf16[32,64], index: 2, kind: input, shape index: {}]   ;;  %s813_s3 = inlined_call_operand.hbm [shape: bf16[32,64], index: 3, kind: input, shape index: {}]   ;;  %s814_s4 = inlined_call_operand.hbm [shape: bf16[16,64], index: 4, kind: output, shape index: {0}]   ;;  %s815_s5 = inlined_call_operand.hbm [shape: bf16[16,64], index: 5, kind: output, shape index: {1}]   ;;  %s816_s6 = inlined_call_operand.hbm [shape: bf16[16,64], index: 6, kind: output, shape index: {2}]  }
   0x1   :  { %13 = vsyncpa [#allocation9], 0 }
   0x2   :  { %14 = vsyncpa [#allocation12], 0 }
   0x3   :  { %15 = vsyncpa [#allocation7], 0 }
   0x4   :  { %16 = vsyncpa [#allocation15], 0  ;;  %s617_s21 = smov [#allocation8]   ;;  %s618_s23 = smov [#allocation5]  }
   0x5   :  { %s34_s22 = sshll.u32 %s617_s21, 4  ;;  %s22_s24 = sshll.u32 %s618_s23, 4  ;;  %s35_s22 = int_to_ptr.vmem [resolvable:$true] %s34_s22  ;;  %s663_s24 = int_to_ptr.vmem [resolvable:$true] %s22_s24 }
   0x6   :  { %s453_s27 = scalar_lea.hbm %s811_s1, 256 }
   0x7   :  { %p454_p0 = scmp.ne.s32.totalorder %s811_s1, %s453_s27  ;;  %p457_p1 = scmp.lt.u32.totalorder %s453_s27, %s811_s1 }
   0x9   :  { %p459_p2 = pnand %p457_p1, %p454_p0 }
   0xb   :  { %462 = shalt.err (!%p459_p2)
}
   0xc   :  { %s463_s8 = scalar_lea.vmem %s35_s22, 256  ;;  %p468_p4 = scmp.lt.s32.totalorder %s35_s22, %s35_s22 }
   0xd   :  { %p464_p3 = scmp.ne.s32.totalorder %s35_s22, %s463_s8  ;;  %p469_p5 = scmp.lt.s32.totalorder %s463_s8, %s463_s8 }
   0xf   :  { %p470_p6 = por %p469_p5, %p468_p4 }
  0x11   :  { %p471_p7 = pnand %p470_p6, %p464_p3 }
  0x13   :  { %474 = shalt.err (!%p471_p7)
}
  0x14   :  { %s619_s9 = smov 64   ;;  %s620_s10 = smov 4  }
  0x15   :  { %40 = dma.hbm_to_vmem [thread:$0]  %s811_s1, 256, %s35_s22, [#allocation9], %s619_s9, %s619_s9, %s620_s10  }
  0x16   :  { %s475_s15 = scalar_lea.hbm %s810_s0, 128 }
  0x17   :  { %p476_p8 = scmp.ne.s32.totalorder %s810_s0, %s475_s15  ;;  %p479_p9 = scmp.lt.u32.totalorder %s475_s15, %s810_s0 }
  0x19   :  { %p481_p10 = pnand %p479_p9, %p476_p8 }
  0x1b   :  { %484 = shalt.err (!%p481_p10)
}
  0x1c   :  { %s485_s20 = scalar_lea.vmem %s663_s24, 128  ;;  %p490_p12 = scmp.lt.s32.totalorder %s663_s24, %s663_s24 }
  0x1d   :  { %p486_p11 = scmp.ne.s32.totalorder %s663_s24, %s485_s20  ;;  %p491_p13 = scmp.lt.s32.totalorder %s485_s20, %s485_s20 }
  0x1f   :  { %p492_p0 = por %p491_p13, %p490_p12 }
  0x21   :  { %p493_p1 = pnand %p492_p0, %p486_p11 }
  0x23   :  { %496 = shalt.err (!%p493_p1)
}
  0x24   :  { %28 = dma.hbm_to_vmem [thread:$0]  %s810_s0, 128, %s663_s24, [#allocation6], %s619_s9, %s619_s9, %s620_s10  }
  0x25   :  { %s621_s22 = smov [#allocation10]   ;;  %s622_s25 = smov [#allocation11]  }
  0x26   :  { %s46_s23 = sshll.u32 %s621_s22, 4  ;;  %s58_s26 = sshll.u32 %s622_s25, 4  ;;  %s47_s23 = int_to_ptr.vmem [resolvable:$true] %s46_s23  ;;  %s700_s26 = int_to_ptr.vmem [resolvable:$true] %s58_s26 }
  0x27   :  { %s497_s29 = scalar_lea.hbm %s812_s2, 256 }
  0x28   :  { %p498_p2 = scmp.ne.s32.totalorder %s812_s2, %s497_s29  ;;  %p501_p3 = scmp.lt.u32.totalorder %s497_s29, %s812_s2 }
  0x2a   :  { %p503_p4 = pnand %p501_p3, %p498_p2 }
  0x2c   :  { %506 = shalt.err (!%p503_p4)
}
  0x2d   :  { %s507_s0 = scalar_lea.vmem %s47_s23, 256  ;;  %p512_p6 = scmp.lt.s32.totalorder %s47_s23, %s47_s23 }
  0x2e   :  { %p508_p5 = scmp.ne.s32.totalorder %s47_s23, %s507_s0  ;;  %p513_p7 = scmp.lt.s32.totalorder %s507_s0, %s507_s0 }
  0x30   :  { %p514_p8 = por %p513_p7, %p512_p6 }
  0x32   :  { %p515_p9 = pnand %p514_p8, %p508_p5 }
  0x34   :  { %518 = shalt.err (!%p515_p9)
}
  0x35   :  { %52 = dma.hbm_to_vmem [thread:$0]  %s812_s2, 256, %s47_s23, [#allocation9], %s619_s9, %s619_s9, %s620_s10  }
  0x36   :  { %s519_s15 = scalar_lea.hbm %s813_s3, 256 }
  0x37   :  { %p520_p10 = scmp.ne.s32.totalorder %s813_s3, %s519_s15  ;;  %p523_p11 = scmp.lt.u32.totalorder %s519_s15, %s813_s3 }
  0x39   :  { %p525_p12 = pnand %p523_p11, %p520_p10 }
  0x3b   :  { %528 = shalt.err (!%p525_p12)
}
  0x3c   :  { %s529_s20 = scalar_lea.vmem %s700_s26, 256  ;;  %p534_p0 = scmp.lt.s32.totalorder %s700_s26, %s700_s26 }
  0x3d   :  { %p530_p13 = scmp.ne.s32.totalorder %s700_s26, %s529_s20  ;;  %p535_p1 = scmp.lt.s32.totalorder %s529_s20, %s529_s20 }
  0x3f   :  { %p536_p2 = por %p535_p1, %p534_p0 }
  0x41   :  { %p537_p3 = pnand %p536_p2, %p530_p13 }
  0x43   :  { %540 = shalt.err (!%p537_p3)
}
  0x44   :  { %64 = dma.hbm_to_vmem [thread:$0]  %s813_s3, 256, %s700_s26, [#allocation12], %s619_s9, %s619_s9, %s620_s10  }
  0x45   :  { %607 = dma.done.wait [#allocation6], 128  }
  0x46   :  { %608 = vsyncadd [#allocation6], 4294967168 }
  0x47   :  { %609 = dma.done.wait [#allocation9], 512  }
  0x48   :  { %610 = vsyncadd [#allocation9], 4294966784 }
  0x49   :  { %611 = dma.done.wait [#allocation12], 256  }
  0x4a   :  { %612 = vsyncadd [#allocation12], 4294967040  ;;  %vm82_vm0 = vcmask 523264   ;;  %v623_v0 = vmov 0.0   ;;  %vm624_vm1 = vmmov 0   ;;  %v446_v1 = vld [vmem:[#allocation8] sm:$0xff]  }
  0x4b   :  { %411 = vmatprep.subr.bf16.mxu0 %v623_v0  ;;  %419 = vmatprep.subr.bf16.mxu1 %v623_v0  ;;  %83 = vst.msk [vmem:[#allocation2] sm:$0xff] %vm82_vm0, %v623_v0  ;;  %84 = vst.msk [vmem:[#allocation2 + $0x8] sm:$0xff] %vm82_vm0, %v623_v0  ;;  %v447_v2 = vld [vmem:[#allocation8 + $0x8] sm:$0xff]   ;;  %v448_v3 = vld [vmem:[#allocation10] sm:$0xff]   ;;  %vm114_vm2 = vcmask 261120   ;;  %vm303_vm3 = vcmask 519168  }
  0x4c   :  { %85 = vst.msk [vmem:[#allocation3] sm:$0xff] %vm82_vm0, %v623_v0  ;;  %86 = vst.msk [vmem:[#allocation3 + $0x8] sm:$0xff] %vm82_vm0, %v623_v0  ;;  %415 = vmatprep.mubr.msk.bf16.mxu0 %vm624_vm1, %v623_v0  ;;  %423 = vmatprep.mubr.msk.bf16.mxu1 %vm624_vm1, %v623_v0  ;;  %v449_v4 = vld [vmem:[#allocation5] sm:$0xff]   ;;  %v450_v6 = vld [vmem:[#allocation11] sm:$0xff]   ;;  %s625_s3 = smov [#allocation13]   ;;  %s626_s22 = smov [#allocation14]  }
  0x4d   :  { %87 = vst.msk [vmem:[#allocation4] sm:$0xff] %vm82_vm0, %v623_v0  ;;  %88 = vst.msk [vmem:[#allocation4 + $0x8] sm:$0xff] %vm82_vm0, %v623_v0  ;;  %412 = vmatpush3.bf16.msra.mxu0 %v446_v1  ;;  %420 = vmatpush3.bf16.msra.mxu1 %v448_v3  ;;  %v451_v5 = vld [vmem:[#allocation10 + $0x8] sm:$0xff]   ;;  %v452_v7 = vld [vmem:[#allocation11 + $0x8] sm:$0xff]   ;;  %s335_s21 = sshll.u32 %s625_s3, 4  ;;  %s347_s23 = sshll.u32 %s626_s22, 4  ;;  %s336_s21 = int_to_ptr.vmem [resolvable:$true] %s335_s21  ;;  %s754_s23 = int_to_ptr.vmem [resolvable:$true] %s347_s23 }
  0x4e   :  { %413 = vmatprep.subr.bf16.mxu0 %v623_v0  ;;  %421 = vmatprep.subr.bf16.mxu1 %v623_v0  ;;  %s541_s25 = scalar_lea.vmem %s336_s21, 128  ;;  %p546_p5 = scmp.lt.s32.totalorder %s336_s21, %s336_s21 }
  0x4f   :  { %p542_p4 = scmp.ne.s32.totalorder %s336_s21, %s541_s25  ;;  %p547_p6 = scmp.lt.s32.totalorder %s541_s25, %s541_s25 }
  0x51   :  { %414 = vmatpush3.bf16.msra.mxu0 %v447_v2  ;;  %422 = vmatpush3.bf16.msra.mxu1 %v451_v5  ;;  %p548_p7 = por %p547_p6, %p546_p5 }
  0x52   :  { %427 = vmatprep.subr.bf16.mxu0 %v623_v0  ;;  %v91_v8 = vld [vmem:[#allocation2] sm:$0xff]  ;;  %v92_v10 = vld [vmem:[#allocation2 + $0x8] sm:$0xff] }
  0x53   :  { %v164_v11 = vld [vmem:[#allocation3] sm:$0xff]  ;;  %v165_v16 = vld [vmem:[#allocation3 + $0x8] sm:$0xff]  ;;  %p549_p8 = pnand %p548_p7, %p542_p4 }
  0x54   :  { %416 = vmatmul.mubr.msk.bf16.vlgmr.msra.gmra.mrb[0].mxu0 %vm114_vm2, %v449_v4  ;;  %424 = vmatmul.mubr.msk.bf16.vlgmr.msra.gmra.mrb[0].mxu1 %vm114_vm2, %v449_v4  ;;  %v227_v24 = vld [vmem:[#allocation4] sm:$0xff]  ;;  %v228_v26 = vld [vmem:[#allocation4 + $0x8] sm:$0xff] }
  0x55   :  { %428 = vmatpush3.bf16.msra.mxu0 %v450_v6  ;;  %431 = vmatprep.mubr.msk.bf16.mxu0 %vm624_vm1, %v623_v0 }
  0x56   :  { %429 = vmatprep.subr.bf16.mxu0 %v623_v0 }
  0x59   :  { %430 = vmatpush3.bf16.msra.mxu0 %v452_v7 }
  0x5c   :  { %432 = vmatmul.mubr.msk.bf16.vlgmr.msra.gmra.mrb[4].mxu0 %vm114_vm2, %v449_v4 }
 0x127   :  { %v152_v9 = vpop.f32.mrb[0].mxu0  ;;  %v216_v15 = vpop.f32.mrb[0].mxu1 }
 0x128   :  { %v159_v12 = vadd.f32 %v152_v9, %v91_v8  ;;  %v417_v13 = vpop.f32.mrb[1].mxu0  ;;  %v223_v19 = vadd.f32 %v216_v15, %v164_v11  ;;  %v425_v20 = vpop.f32.mrb[1].mxu1 }
 0x129   :  { %v155_v14 = vpop.f32.mrb[2].mxu0  ;;  %v219_v21 = vpop.f32.mrb[2].mxu1 }
 0x12a   :  { %162 = vst.msk [vmem:[#allocation2] sm:$0xff] %vm82_vm0, %v159_v12  ;;  %v160_v17 = vadd.f32 %v155_v14, %v92_v10  ;;  %v418_v18 = vpop.f32.mrb[3].mxu0  ;;  %225 = vst.msk [vmem:[#allocation3] sm:$0xff] %vm82_vm0, %v223_v19  ;;  %v224_v22 = vadd.f32 %v219_v21, %v165_v16  ;;  %v426_v23 = vpop.f32.mrb[3].mxu1 }
 0x12c   :  { %163 = vst.msk [vmem:[#allocation2 + $0x8] sm:$0xff] %vm82_vm0, %v160_v17  ;;  %226 = vst.msk [vmem:[#allocation3 + $0x8] sm:$0xff] %vm82_vm0, %v224_v22 }
 0x12f   :  { %v279_v25 = vpop.f32.mrb[4].mxu0 }
 0x130   :  { %v286_v27 = vadd.f32 %v279_v25, %v227_v24  ;;  %v433_v28 = vpop.f32.mrb[5].mxu0 }
 0x131   :  { %v282_v29 = vpop.f32.mrb[6].mxu0  ;;  %v293_v30 = vld [vmem:[#allocation2] sm:$0xff]  ;;  %v306_v34 = vld [vmem:[#allocation3] sm:$0xff] }
 0x132   :  { %288 = vst.msk [vmem:[#allocation4] sm:$0xff] %vm82_vm0, %v286_v27  ;;  %v287_v31 = vadd.f32 %v282_v29, %v228_v26  ;;  %v434_v32 = vpop.f32.mrb[7].mxu0  ;;  %v396_v33 = vpack.c.bf16 %v293_v30, %v293_v30  ;;  %v398_v36 = vpack.c.bf16 %v306_v34, %v306_v34 }
 0x133   :  { %v294_v35 = vld [vmem:[#allocation2 + $0x8] sm:$0xff]  ;;  %v307_v38 = vld [vmem:[#allocation3 + $0x8] sm:$0xff] }
 0x134   :  { %289 = vst.msk [vmem:[#allocation4 + $0x8] sm:$0xff] %vm82_vm0, %v287_v31  ;;  %v397_v37 = vpack.c.bf16 %v294_v35, %v294_v35  ;;  %v399_v39 = vpack.c.bf16 %v307_v38, %v307_v38 }
 0x135   :  { %304 = vst.msk [vmem:[#allocation13] sm:$0xf] %vm303_vm3, %v396_v33  ;;  %316 = vst.msk [vmem:[#allocation14] sm:$0xf] %vm303_vm3, %v398_v36 }
 0x136   :  { %305 = vst.msk [vmem:[#allocation13 + $0x4] sm:$0xf] %vm303_vm3, %v397_v37 }
 0x137   :  { %552 = shalt.err (!%p549_p8)
}
 0x138   :  { %s553_s28 = scalar_lea.hbm %s814_s4, 128 }
 0x139   :  { %p554_p9 = scmp.ne.s32.totalorder %s814_s4, %s553_s28  ;;  %p557_p10 = scmp.lt.u32.totalorder %s553_s28, %s814_s4 }
 0x13b   :  { %p559_p11 = pnand %p557_p10, %p554_p9 }
 0x13d   :  { %562 = shalt.err (!%p559_p11)
}
 0x13e   :  { %341 = dma.vmem_to_hbm [thread:$0]  %s336_s21, 128, %s814_s4, [#allocation7], %s619_s9, %s619_s9, %s620_s10   ;;  %317 = vst.msk [vmem:[#allocation14 + $0x4] sm:$0xf] %vm303_vm3, %v399_v39 }
 0x13f   :  { %s627_s24 = smov [#allocation16]   ;;  %s563_s13 = scalar_lea.vmem %s754_s23, 128 }
 0x140   :  { %s359_s12 = sshll.u32 %s627_s24, 4  ;;  %p564_p12 = scmp.ne.s32.totalorder %s754_s23, %s563_s13  ;;  %s360_s12 = int_to_ptr.vmem [resolvable:$true] %s359_s12 }
 0x141   :  { %p568_p13 = scmp.lt.s32.totalorder %s754_s23, %s754_s23  ;;  %p569_p0 = scmp.lt.s32.totalorder %s563_s13, %s563_s13 }
 0x143   :  { %p570_p1 = por %p569_p0, %p568_p13 }
 0x145   :  { %p571_p2 = pnand %p570_p1, %p564_p12 }
 0x147   :  { %574 = shalt.err (!%p571_p2)
}
 0x148   :  { %s575_s16 = scalar_lea.hbm %s815_s5, 128 }
 0x149   :  { %p576_p3 = scmp.ne.s32.totalorder %s815_s5, %s575_s16  ;;  %p579_p4 = scmp.lt.u32.totalorder %s575_s16, %s815_s5 }
 0x14b   :  { %p581_p5 = pnand %p579_p4, %p576_p3 }
 0x14d   :  { %584 = shalt.err (!%p581_p5)
}
 0x14e   :  { %353 = dma.vmem_to_hbm [thread:$0]  %s754_s23, 128, %s815_s5, [#allocation15], %s619_s9, %s619_s9, %s620_s10   ;;  %v318_v40 = vld [vmem:[#allocation4] sm:$0xff]  ;;  %v319_v42 = vld [vmem:[#allocation4 + $0x8] sm:$0xff] }
 0x14f   :  { %v400_v41 = vpack.c.bf16 %v318_v40, %v318_v40  ;;  %v401_v43 = vpack.c.bf16 %v319_v42, %v319_v42  ;;  %s585_s1 = scalar_lea.vmem %s360_s12, 128  ;;  %p590_p7 = scmp.lt.s32.totalorder %s360_s12, %s360_s12 }
 0x150   :  { %p586_p6 = scmp.ne.s32.totalorder %s360_s12, %s585_s1  ;;  %p591_p8 = scmp.lt.s32.totalorder %s585_s1, %s585_s1 }
 0x151   :  { %328 = vst.msk [vmem:[#allocation16] sm:$0xf] %vm303_vm3, %v400_v41  ;;  %329 = vst.msk [vmem:[#allocation16 + $0x4] sm:$0xf] %vm303_vm3, %v401_v43 }
 0x152   :  { %p592_p9 = por %p591_p8, %p590_p7 }
 0x154   :  { %p593_p10 = pnand %p592_p9, %p586_p6 }
 0x156   :  { %596 = shalt.err (!%p593_p10)
}
 0x157   :  { %s597_s5 = scalar_lea.hbm %s816_s6, 128 }
 0x158   :  { %p598_p11 = scmp.ne.s32.totalorder %s816_s6, %s597_s5  ;;  %p601_p12 = scmp.lt.u32.totalorder %s597_s5, %s816_s6 }
 0x15a   :  { %p603_p13 = pnand %p601_p12, %p598_p11 }
 0x15c   :  { %606 = shalt.err (!%p603_p13)
}
 0x15d   :  { %365 = dma.vmem_to_hbm [thread:$0]  %s360_s12, 128, %s816_s6, [#allocation15], %s619_s9, %s619_s9, %s620_s10  }
 0x15e   :  { %613 = dma.done.wait [#allocation7], 128  }
 0x15f   :  { %614 = vsyncadd [#allocation7], 4294967168 }
 0x160   :  { %615 = dma.done.wait [#allocation15], 256  }
 0x161   :  { %616 = vsyncadd [#allocation15], 4294967040 }
 0x162   :  { %375 = vsyncpa [#allocation6], 1 }
 0x163   :  { %376 = vsyncpa [#allocation9], 1 }
 0x164   :  { %377 = vsyncpa [#allocation12], 1 }
 0x165   :  { %378 = vsyncpa [#allocation7], 1 }
 0x166   :  { %379 = vsyncpa [#allocation15], 1 }

</bundles_post_ra>
